<compile_context>
chip_gen: v7x
topology: tpu7x:2x2x1
jax: 0.10.0
libtpu: 0.0.40
codegen_flags: <defaults>
</compile_context>

<pallas_src>
import functools

import jax
import jax.numpy as jnp
from jax import lax
from jax.experimental import pallas as pl
from jax.experimental.pallas import tpu as pltpu

_BATCHED_LAST_DIM_CONTRACT = (((2,), (2,)), ((0,), (0,)))  # contract last dims, batch dim 0


# ---------------------------------------------------------------------------
# Kernels
# ---------------------------------------------------------------------------
def _sdpa_kernel(q_ref, k_ref, v_ref, out_ref, attn_ref, *, compute_dtype):
    # Blocks: q (bb, tq, D), k (bb, Lk, D), v (bb, Dv, Lk),
    #         out (bb, Dv, tq), attn (bb, tq, Lk).
    q = q_ref[...]
    k = k_ref[...]
    v = v_ref[...]
    if compute_dtype is not None:
        q = q.astype(compute_dtype)
        k = k.astype(compute_dtype)
        v = v.astype(compute_dtype)

    # scores = q @ k^T as a direct last-dim contraction (no XLU transpose), f32 acc.
    scores = lax.dot_general(
        q, k, _BATCHED_LAST_DIM_CONTRACT, preferred_element_type=jnp.float32
    )  # (bb, tq, Lk), f32

    # Softmax over the key axis, all math in f32.  Exact normalization: the per-row
    # reciprocal is negligible work, and attn is a user-visible output (it may be fed
    # back through the cached_attn path), so rows must sum to 1 exactly.
    m = jnp.max(scores, axis=-1, keepdims=True)
    e = jnp.exp(scores - m)
    attn_f32 = e / jnp.sum(e, axis=-1, keepdims=True)

    # Store attn; the second matmul consumes the stored values (re-cast to the MXU
    # compute dtype when that differs from the attn storage dtype).
    attn_out = attn_f32.astype(attn_ref.dtype)
    attn_ref[...] = attn_out

    # output = v @ attn^T as a direct last-dim contraction over Lk.
    out_ref[...] = lax.dot_general(
        v,
        attn_out.astype(v.dtype),
        _BATCHED_LAST_DIM_CONTRACT,
        preferred_element_type=jnp.float32,
    ).astype(out_ref.dtype)


def _cached_attn_kernel(v_ref, attn_ref, out_ref, *, compute_dtype):
    # output = v @ cached_attn^T, transpose-free, low-precision MXU inputs, f32 acc.
    mm_dtype = compute_dtype if compute_dtype is not None else v_ref.dtype
    out_ref[...] = lax.dot_general(
        v_ref[...].astype(mm_dtype),
        attn_ref[...].astype(mm_dtype),
        _BATCHED_LAST_DIM_CONTRACT,
        preferred_element_type=jnp.float32,
    ).astype(out_ref.dtype)


# ---------------------------------------------------------------------------
# VMEM budget + tiling heuristics
# ---------------------------------------------------------------------------
def _vmem_budget_bytes():
    """~75% of this generation's per-core VMEM; conservative 48 MiB fallback (v7x)."""
    cap = None
    try:
        cap = int(pltpu.get_tpu_info().vmem_capacity_bytes)
    except Exception:
        cap = None
    if not cap or cap <= 0:
        cap = 64 << 20
    return (cap * 3) // 4


def _pad_lq(Lq):
    """Pad Lq to a multiple of 128 when it is big enough to tile.

    Lane-dense out tiles (tq multiple of 128) avoid masked partial stores.  Tiny Lq
    keeps full-dim blocks instead: padding 8 -> 128 would inflate attn writeback 16x.
    """
    if Lq <= 128 or Lq % 128 == 0:
        return Lq
    return ((Lq + 127) // 128) * 128


def _estimate_vmem_bytes(bb, tq, Lk, D, Dv, in_isz, attn_isz, out_isz, compute_isz):
    # Double-buffered pipeline tiles (k/v only change per batch block, but count both
    # buffers to stay conservative).
    tiles = bb * 2 * (
        tq * D * in_isz        # q
        + Lk * D * in_isz      # k
        + Dv * Lk * in_isz     # v
        + Dv * tq * out_isz    # out
        + tq * Lk * attn_isz   # attn
    )
    # In-kernel temporaries: f32 scores / exp / attn plus low-precision matmul operands.
    temps = bb * (
        3 * tq * Lk * 4
        + tq * Lk * attn_isz
        + (tq * D + Lk * D + Dv * Lk + tq * Lk) * compute_isz
    )
    return tiles + temps


def _select_tiles(B, Lq_p, Lk, D, Dv, in_isz, attn_isz, out_isz, compute_isz, budget):
    est = functools.partial(
        _estimate_vmem_bytes, Lk=Lk, D=D, Dv=Dv, in_isz=in_isz,
        attn_isz=attn_isz, out_isz=out_isz, compute_isz=compute_isz)

    # Grow tq first: tq is the MXU M dimension; batch folding only amortizes the
    # ~0.35us per-grid-step overhead, it does not enlarge the MXU operands.
    tq_cands = [t for t in (512, 256, 128) if Lq_p % t == 0] or [Lq_p]
    tq = tq_cands[-1]
    for t in tq_cands:
        if est(bb=1, tq=t) <= budget:
            tq = t
            break

    # Then fold batch elements while the estimate still fits the budget.
    bb = 1
    for cand in range(B, 0, -1):
        if B % cand == 0 and est(bb=cand, tq=tq) <= budget:
            bb = cand
            break
    return bb, tq


# ---------------------------------------------------------------------------
# Wrapper
# ---------------------------------------------------------------------------
def scaled_dot_product_attention(q, k, v, cached_attn=None, *,
                                 compute_dtype=jnp.bfloat16, attn_dtype=None):
    """q: (B, Lq, D), k: (B, Lk, D), v: (B, Dv, Lk) -> (out (B, Dv, Lq), attn (B, Lq, Lk)).

    compute_dtype: dtype of the MXU matmul inputs (default bf16; accumulation is f32).
                   Pass jnp.float32 (or None) for an exact-precision path.
    attn_dtype:    storage dtype of the returned attention matrix (default: q.dtype).
                   Pass jnp.bfloat16 to halve the dominant attn HBM writeback.
    """
    B, Lq, D = q.shape
    _, Dv, Lk = v.shape
    out_dtype = q.dtype
    a_dtype = jnp.dtype(attn_dtype) if attn_dtype is not None else jnp.dtype(q.dtype)

    in_isz = jnp.dtype(q.dtype).itemsize
    attn_isz = a_dtype.itemsize
    out_isz = jnp.dtype(out_dtype).itemsize
    c_isz = jnp.dtype(compute_dtype).itemsize if compute_dtype is not None else in_isz

    budget = _vmem_budget_bytes()
    Lq_p = _pad_lq(Lq)
    bb, tq = _select_tiles(B, Lq_p, Lk, D, Dv, in_isz, attn_isz, out_isz, c_isz, budget)
    grid = (B // bb, Lq_p // tq)

    cparams = pltpu.CompilerParams(
        # Megacore split on the batch axis only: sharding the Lq axis would make both
        # TensorCores DMA the same full-K/V blocks.  Near-zero effect on 1-TC chips.
        dimension_semantics=("parallel", "arbitrary"),
        vmem_limit_bytes=int(budget),
    )

    if cached_attn is not None:
        attn_in = cached_attn
        if Lq_p != Lq:
            attn_in = jnp.pad(cached_attn, ((0, 0), (0, Lq_p - Lq), (0, 0)))
        out = pl.pallas_call(
            functools.partial(_cached_attn_kernel, compute_dtype=compute_dtype),
            out_shape=jax.ShapeDtypeStruct((B, Dv, Lq_p), out_dtype),
            grid_spec=pltpu.PrefetchScalarGridSpec(
                num_scalar_prefetch=0,
                grid=grid,
                in_specs=[
                    pl.BlockSpec((bb, Dv, Lk), lambda b, i: (b, 0, 0)),
                    pl.BlockSpec((bb, tq, Lk), lambda b, i: (b, i, 0)),
                ],
                out_specs=pl.BlockSpec((bb, Dv, tq), lambda b, i: (b, 0, i)),
            ),
            compiler_params=cparams,
        )(v, attn_in)
        if Lq_p != Lq:
            out = out[:, :, :Lq]
        return out, cached_attn

    q_in = q if Lq_p == Lq else jnp.pad(q, ((0, 0), (0, Lq_p - Lq), (0, 0)))

    out, attn = pl.pallas_call(
        functools.partial(_sdpa_kernel, compute_dtype=compute_dtype),
        out_shape=(
            jax.ShapeDtypeStruct((B, Dv, Lq_p), out_dtype),
            jax.ShapeDtypeStruct((B, Lq_p, Lk), a_dtype),
        ),
        grid_spec=pltpu.PrefetchScalarGridSpec(
            num_scalar_prefetch=0,
            grid=grid,
            in_specs=[
                pl.BlockSpec((bb, tq, D), lambda b, i: (b, i, 0)),   # q tile
                pl.BlockSpec((bb, Lk, D), lambda b, i: (b, 0, 0)),   # full k per batch block
                pl.BlockSpec((bb, Dv, Lk), lambda b, i: (b, 0, 0)),  # full v per batch block
            ],
            out_specs=[
                pl.BlockSpec((bb, Dv, tq), lambda b, i: (b, 0, i)),  # out column block
                pl.BlockSpec((bb, tq, Lk), lambda b, i: (b, i, 0)),  # attn row block
            ],
        ),
        compiler_params=cparams,
    )(q_in, k, v)

    if Lq_p != Lq:
        out = out[:, :, :Lq]
        attn = attn[:, :Lq, :]
    return out, attn


# ---------------------------------------------------------------------------
# Reference + demo
# ---------------------------------------------------------------------------
def _reference(q, k, v):
    scores = jnp.einsum("bqd,bkd->bqk", q, k, precision="highest")
    attn = jax.nn.softmax(scores, axis=-1)
    out = jnp.einsum("bvk,bqk->bvq", v, attn, precision="highest")
    return out, attn


if __name__ == "__main__":
    def _check(name, got, want, tol):
        assert got.shape == want.shape, (name, got.shape, want.shape)
        assert bool(jnp.all(jnp.isfinite(got))), name
        assert bool(jnp.allclose(got, want, atol=tol, rtol=tol)), (
            name, float(jnp.max(jnp.abs(got - want))))

    root = jax.random.PRNGKey(0)

    # --- Case 1: small shapes (full-dim blocks); exact f32 path, default bf16 path,
    #             and the cached_attn path.
    B, Lq, Lk, D, Dv = 2, 8, 8, 32, 32
    kq, kk, kv = jax.random.split(root, 3)
    q = 0.25 * jax.random.normal(kq, (B, Lq, D), dtype=jnp.float32)
    k = 0.25 * jax.random.normal(kk, (B, Lk, D), dtype=jnp.float32)
    v = jax.random.normal(kv, (B, Dv, Lk), dtype=jnp.float32)
    ref_out, ref_attn = _reference(q, k, v)

    out32, attn32 = scaled_dot_product_attention(q, k, v, compute_dtype=jnp.float32)
    jax.block_until_ready((out32, attn32))
    _check("attn[f32]", attn32, ref_attn, 5e-2)
    _check("out[f32]", out32, ref_out, 5e-2)

    out_bf, attn_bf = scaled_dot_product_attention(q, k, v)  # default: bf16 MXU inputs
    jax.block_until_ready((out_bf, attn_bf))
    _check("attn[bf16]", attn_bf, ref_attn, 5e-2)
    _check("out[bf16]", out_bf, ref_out, 5e-2)

    out_c, attn_c = scaled_dot_product_attention(q, k, v, cached_attn=ref_attn)
    jax.block_until_ready(out_c)
    assert attn_c is ref_attn
    _check("out[cached]", out_c, ref_out, 5e-2)

    # --- Case 2: Lq tiled into multiple grid steps along the query axis.
    B, Lq, Lk, D, Dv = 2, 384, 256, 64, 64
    kq, kk, kv = jax.random.split(jax.random.fold_in(root, 1), 3)
    q = 0.125 * jax.random.normal(kq, (B, Lq, D), dtype=jnp.float32)
    k = 0.125 * jax.random.normal(kk, (B, Lk, D), dtype=jnp.float32)
    v = jax.random.normal(kv, (B, Dv, Lk), dtype=jnp.float32)
    ref_out, ref_attn = _reference(q, k, v)
    out_t, attn_t = scaled_dot_product_attention(q, k, v)
    jax.block_until_ready((out_t, attn_t))
    _check("attn[tiled]", attn_t, ref_attn, 5e-2)
    _check("out[tiled]", out_t, ref_out, 5e-2)

    # --- Case 3: Lq not a multiple of 128 (padded internally, outputs sliced back).
    B, Lq, Lk, D, Dv = 2, 200, 256, 64, 64
    kq, kk, kv = jax.random.split(jax.random.fold_in(root, 2), 3)
    q = 0.125 * jax.random.normal(kq, (B, Lq, D), dtype=jnp.float32)
    k = 0.125 * jax.random.normal(kk, (B, Lk, D), dtype=jnp.float32)
    v = jax.random.normal(kv, (B, Dv, Lk), dtype=jnp.float32)
    ref_out, ref_attn = _reference(q, k, v)
    out_p, attn_p = scaled_dot_product_attention(q, k, v)
    jax.block_until_ready((out_p, attn_p))
    _check("attn[padded]", attn_p, ref_attn, 5e-2)
    _check("out[padded]", out_p, ref_out, 5e-2)

    print("KERNEL_OK")
</pallas_src>

<mosaic_0001>
module attributes {stable_mosaic.version = 11 : i64} {
  func.func @_sdpa_kernel(%arg0: i32, %arg1: i32, %arg2: memref<2x8x32xf32, #tpu.memory_space<vmem>>, %arg3: memref<2x8x32xf32, #tpu.memory_space<vmem>>, %arg4: memref<2x32x8xf32, #tpu.memory_space<vmem>>, %arg5: memref<2x32x8xf32, #tpu.memory_space<vmem>>, %arg6: memref<2x8x8xf32, #tpu.memory_space<vmem>>) attributes {dimension_semantics = [#tpu.dimension_semantics<parallel>, #tpu.dimension_semantics<arbitrary>], iteration_bounds = array<i64: 1, 1>, scalar_prefetch = 0 : i64, scratch_operands = 0 : i64, tpu.core_type = #tpu.core_type<tc>, window_params = [{transform_indices = @transform_0, window_bounds = array<i64: 2, 8, 32>}, {transform_indices = @transform_1, window_bounds = array<i64: 2, 8, 32>}, {transform_indices = @transform_2, window_bounds = array<i64: 2, 32, 8>}, {transform_indices = @transform_3, window_bounds = array<i64: 2, 32, 8>}, {transform_indices = @transform_4, window_bounds = array<i64: 2, 8, 8>}]} {
    %c0 = arith.constant 0 : index
    %c0_0 = arith.constant 0 : index
    %c0_1 = arith.constant 0 : index
    %0 = vector.load %arg2[%c0, %c0_0, %c0_1] : memref<2x8x32xf32, #tpu.memory_space<vmem>>, vector<2x8x32xf32>
    %c0_2 = arith.constant 0 : index
    %c0_3 = arith.constant 0 : index
    %c0_4 = arith.constant 0 : index
    %1 = vector.load %arg3[%c0_2, %c0_3, %c0_4] : memref<2x8x32xf32, #tpu.memory_space<vmem>>, vector<2x8x32xf32>
    %c0_5 = arith.constant 0 : index
    %c0_6 = arith.constant 0 : index
    %c0_7 = arith.constant 0 : index
    %2 = vector.load %arg4[%c0_5, %c0_6, %c0_7] : memref<2x32x8xf32, #tpu.memory_space<vmem>>, vector<2x32x8xf32>
    %cst = arith.constant dense<0.000000e+00> : vector<2x8x8xf32>
    %3 = tpu.matmul %0, %1, %cst {dimension_numbers = #tpu.dot_dimension_numbers<[2], [2], [1], [1], [0, 0, 0, 1, 1, 1], [0], [0]>} : vector<2x8x32xf32>, vector<2x8x32xf32>, vector<2x8x8xf32> -> vector<2x8x8xf32>
    %cst_8 = arith.constant dense<0xFF800000> : vector<2x8xf32>
    %4 = vector.multi_reduction <maximumf>, %3, %cst_8 [2] : vector<2x8x8xf32> to vector<2x8xf32>
    %5 = vector.shape_cast %4 : vector<2x8xf32> to vector<2x8x1xf32>
    %6 = vector.broadcast %5 : vector<2x8x1xf32> to vector<2x8x8xf32>
    %7 = arith.subf %3, %6 : vector<2x8x8xf32>
    %8 = math.exp %7 : vector<2x8x8xf32>
    %cst_9 = arith.constant dense<0.000000e+00> : vector<2x8xf32>
    %9 = vector.multi_reduction <add>, %8, %cst_9 [2] : vector<2x8x8xf32> to vector<2x8xf32>
    %10 = vector.shape_cast %9 : vector<2x8xf32> to vector<2x8x1xf32>
    %11 = vector.broadcast %10 : vector<2x8x1xf32> to vector<2x8x8xf32>
    %12 = arith.divf %8, %11 : vector<2x8x8xf32>
    %c0_10 = arith.constant 0 : index
    %c0_11 = arith.constant 0 : index
    %c0_12 = arith.constant 0 : index
    %13 = vector.load %arg6[%c0_10, %c0_11, %c0_12] : memref<2x8x8xf32, #tpu.memory_space<vmem>>, vector<2x8x8xf32>
    tpu.vector_store %arg6[%c0_10, %c0_11, %c0_12], %12 {strides = array<i32>} : memref<2x8x8xf32, #tpu.memory_space<vmem>>, vector<2x8x8xf32>,
    %cst_13 = arith.constant dense<0.000000e+00> : vector<2x32x8xf32>
    %14 = tpu.matmul %2, %12, %cst_13 {dimension_numbers = #tpu.dot_dimension_numbers<[2], [2], [1], [1], [0, 0, 0, 1, 1, 1], [0], [0]>} : vector<2x32x8xf32>, vector<2x8x8xf32>, vector<2x32x8xf32> -> vector<2x32x8xf32>
    %c0_14 = arith.constant 0 : index
    %c0_15 = arith.constant 0 : index
    %c0_16 = arith.constant 0 : index
    %15 = vector.load %arg5[%c0_14, %c0_15, %c0_16] : memref<2x32x8xf32, #tpu.memory_space<vmem>>, vector<2x32x8xf32>
    tpu.vector_store %arg5[%c0_14, %c0_15, %c0_16], %14 {strides = array<i32>} : memref<2x32x8xf32, #tpu.memory_space<vmem>>, vector<2x32x8xf32>,
    return
  }
  func.func @transform_0(%arg0: i32, %arg1: i32) -> (i32, i32, i32) {
    %c0_i32 = arith.constant 0 : i32
    %c0_i32_0 = arith.constant 0 : i32
    return %arg0, %arg1, %c0_i32 : i32, i32, i32
  }
  func.func @transform_1(%arg0: i32, %arg1: i32) -> (i32, i32, i32) {
    %c0_i32 = arith.constant 0 : i32
    %c0_i32_0 = arith.constant 0 : i32
    %c0_i32_1 = arith.constant 0 : i32
    return %arg0, %c0_i32, %c0_i32_0 : i32, i32, i32
  }
  func.func @transform_2(%arg0: i32, %arg1: i32) -> (i32, i32, i32) {
    %c0_i32 = arith.constant 0 : i32
    %c0_i32_0 = arith.constant 0 : i32
    %c0_i32_1 = arith.constant 0 : i32
    return %arg0, %c0_i32, %c0_i32_0 : i32, i32, i32
  }
  func.func @transform_3(%arg0: i32, %arg1: i32) -> (i32, i32, i32) {
    %c0_i32 = arith.constant 0 : i32
    %c0_i32_0 = arith.constant 0 : i32
    return %arg0, %c0_i32, %arg1 : i32, i32, i32
  }
  func.func @transform_4(%arg0: i32, %arg1: i32) -> (i32, i32, i32) {
    %c0_i32 = arith.constant 0 : i32
    %c0_i32_0 = arith.constant 0 : i32
    return %arg0, %arg1, %c0_i32 : i32, i32, i32
  }
}

</mosaic_0001>

<bundles_post_ra>
// kernel: tpu_custom_call.1
= control target key start
LH: loop header
LB: loop body
LE: loop exit
PB: predicated region body
PF: predicated region fallthrough
CT: control target
= control target key end

     0   :  { %vm29_vm0 = vcmask 261120   ;;  %v526_v2 = vmov 0.0   ;;  %vm527_vm1 = vmmov 0   ;;  %s654_s0 = inlined_call_operand.vmem [shape: f32[2,8,32], index: 0, kind: input, shape index: {}]   ;;  %s655_s1 = inlined_call_operand.vmem [shape: f32[2,8,32], index: 1, kind: input, shape index: {}]   ;;  %s656_s2 = inlined_call_operand.vmem [shape: f32[2,32,8], index: 2, kind: input, shape index: {}]   ;;  %s657_s3 = inlined_call_operand.vmem [shape: f32[2,32,8], index: 3, kind: output, shape index: {0}]   ;;  %s658_s4 = inlined_call_operand.hbm [shape: f32[2,8,8], index: 4, kind: output, shape index: {1}]  }
   0x1   :  { %v19_v0 = vld [vmem:[%s655_s1] sm:$0xff]  ;;  %v20_v1 = vld [vmem:[%s655_s1 + $0x8] sm:$0xff]  ;;  %463 = vmatprep.subr.mxu0 %v526_v2  ;;  %465 = vmatprep.mubr.msk.f32.mxu0 %vm527_vm1, %v526_v2 }
   0x2   :  { %10 = vsyncpa [#allocation3], 0  ;;  %464 = vmatpush3.xpose.msk.msra.mxu0 %vm29_vm0, %v19_v0  ;;  %468 = vmatprep.subr.mxu1 %v526_v2  ;;  %v17_v3 = vld [vmem:[%s654_s0] sm:$0xff]  ;;  %v18_v4 = vld [vmem:[%s654_s0 + $0x8] sm:$0xff]  ;;  %vm182_vm2 = vcmask 64512   ;;  %s528_s11 = smov [#allocation2]  }
   0x3   :  { %469 = vmatpush3.xpose.msk.msra.mxu1 %vm29_vm0, %v20_v1  ;;  %470 = vmatprep.mubr.msk.f32.mxu1 %vm527_vm1, %v526_v2  ;;  %v21_v21 = vld [vmem:[%s656_s2] sm:$0xff]  ;;  %v22_v28 = vld [vmem:[%s656_s2 + $0x8] sm:$0xff]  ;;  %v23_v30 = vld [vmem:[%s656_s2 + $0x10] sm:$0xff]  ;;  %s422_s12 = sshll.u32 %s528_s11, 4  ;;  %s423_s12 = int_to_ptr.vmem [resolvable:$true] %s422_s12 }
   0x4   :  { %v25_v22 = vld [vmem:[%s656_s2 + $0x20] sm:$0xff]  ;;  %v26_v31 = vld [vmem:[%s656_s2 + $0x28] sm:$0xff]  ;;  %v24_v32 = vld [vmem:[%s656_s2 + $0x18] sm:$0xff]  ;;  %s502_s13 = scalar_lea.vmem %s423_s12, 256  ;;  %p507_p1 = scmp.lt.s32.totalorder %s423_s12, %s423_s12 }
   0x5   :  { %466 = vmatmul.mubr.msk.f32.vlgmr.msra.gmra.mrb[0].mxu0 %vm29_vm0, %v17_v3  ;;  %v27_v33 = vld [vmem:[%s656_s2 + $0x30] sm:$0xff]  ;;  %v28_v34 = vld [vmem:[%s656_s2 + $0x38] sm:$0xff]  ;;  %p503_p0 = scmp.ne.s32.totalorder %s423_s12, %s502_s13  ;;  %p508_p2 = scmp.lt.s32.totalorder %s502_s13, %s502_s13 }
   0x6   :  { %471 = vmatmul.mubr.msk.f32.vlgmr.msra.gmra.mrb[0].mxu1 %vm29_vm0, %v18_v4  ;;  %475 = vmatprep.mubr.msk.f32.mxu0 %vm182_vm2, %v21_v21 }
   0x7   :  { %483 = vmatprep.mubr.msk.f32.mxu1 %vm182_vm2, %v25_v22  ;;  %p509_p3 = por %p508_p2, %p507_p1 }
   0x9   :  { %p510_p4 = pnand %p509_p3, %p503_p0 }
  0xd8   :  { %v102_v5 = vpop.f32.mrb[0].mxu0 }
  0xd9   :  { %v467_v6 = vpop.f32.mrb[1].mxu0  ;;  %v183_v7 = vsel %vm182_vm2, %v102_v5, -inf  ;;  %v178_v8 = vpop.f32.mrb[0].mxu1 }
  0xda   :  { %184 = vmax.xlane.f32.xlu0 %v183_v7  ;;  %v472_v9 = vpop.f32.mrb[1].mxu1  ;;  %v186_v10 = vsel %vm182_vm2, %v178_v8, -inf }
  0xde   :  { %187 = vmax.xlane.f32.xlu0 %v186_v10 }
 0x167   :  { %v185_v11 = vpop.xlane.xlu0 %184 }
 0x168   :  { %v189_v12 = vsub.f32 %v102_v5, %v185_v11 }
 0x16a   :  { %v191_v13 = vmul.f32 1.442695, %v189_v12 }
 0x16b   :  { %v188_v14 = vpop.xlane.xlu0 %187 }
 0x16c   :  { %494 = vpow2.f32 %v191_v13  ;;  %v190_v15 = vsub.f32 %v178_v8, %v188_v14 }
 0x16e   :  { %v193_v16 = vmul.f32 1.442695, %v190_v15 }
 0x170   :  { %496 = vpow2.f32 %v193_v16 }
 0x176   :  { %v495_v17 = vpop.eup %494 }
 0x177   :  { %v195_v18 = vsel %vm182_vm2, %v495_v17, 0.0 }
 0x178   :  { %196 = vadd.xlane.f32.xlu1 %v195_v18 }
 0x17a   :  { %v497_v19 = vpop.eup %496 }
 0x17b   :  { %v198_v20 = vsel %vm182_vm2, %v497_v19, 0.0 }
 0x17c   :  { %199 = vadd.xlane.f32.xlu1 %v198_v20 }
 0x205   :  { %v197_v23 = vpop.xlane.xlu1 %196 }
 0x206   :  { %498 = vrcp.f32 %v197_v23 }
 0x209   :  { %v200_v24 = vpop.xlane.xlu1 %199 }
 0x20a   :  { %500 = vrcp.f32 %v200_v24 }
 0x210   :  { %v499_v25 = vpop.eup %498 }
 0x211   :  { %v202_v26 = vmul.f32 %v499_v25, %v495_v17 }
 0x213   :  { %473 = vmatprep.subr.msk.mxu0 %vm182_vm2, %v202_v26  ;;  %205 = vst.msk [vmem:[#allocation2] sm:$0xff] %vm182_vm2, %v202_v26 }
 0x214   :  { %v501_v27 = vpop.eup %500  ;;  %474 = vmatpush3.xpose.msk.msra.mxu0 %vm182_vm2, %v202_v26 }
 0x215   :  { %v204_v29 = vmul.f32 %v501_v27, %v497_v19 }
 0x217   :  { %481 = vmatprep.subr.msk.mxu1 %vm182_vm2, %v204_v29  ;;  %206 = vst.msk [vmem:[#allocation2 + $0x8] sm:$0xff] %vm182_vm2, %v204_v29  ;;  %476 = vmatmul.mubr.msk.f32.vlgmr.msra.gmra.mrb[2].mxu0 %vm182_vm2, %v22_v28 }
 0x218   :  { %482 = vmatpush3.xpose.msk.msra.mxu1 %vm182_vm2, %v204_v29  ;;  %478 = vmatprep.mubr.msk.f32.mxu0 %vm182_vm2, %v23_v30 }
 0x21b   :  { %484 = vmatmul.mubr.msk.f32.vlgmr.msra.gmra.mrb[2].mxu1 %vm182_vm2, %v26_v31  ;;  %479 = vmatmul.mubr.msk.f32.gmra.mrb[4].mxu0 %vm182_vm2, %v24_v32 }
 0x21c   :  { %486 = vmatprep.mubr.msk.f32.mxu1 %vm182_vm2, %v27_v33 }
 0x21f   :  { %487 = vmatmul.mubr.msk.f32.gmra.mrb[4].mxu1 %vm182_vm2, %v28_v34 }
 0x220   :  { %513 = shalt.err (!%p510_p4)
}
 0x221   :  { %s514_s16 = scalar_lea.hbm %s658_s4, 256 }
 0x222   :  { %p515_p5 = scmp.ne.s32.totalorder %s658_s4, %s514_s16  ;;  %p518_p6 = scmp.lt.u32.totalorder %s514_s16, %s658_s4 }
 0x224   :  { %p520_p7 = pnand %p518_p6, %p515_p5 }
 0x226   :  { %523 = shalt.err (!%p520_p7)
}
 0x227   :  { %s529_s20 = smov 128   ;;  %s530_s21 = smov 8  }
 0x228   :  { %428 = dma.vmem_to_hbm [thread:$0]  %s423_s12, 256, %s658_s4, [#allocation3], %s529_s20, %s529_s20, %s530_s21  }
 0x2ea   :  { %v477_v35 = vpop.f32.mrb[2].mxu0 }
 0x2eb   :  { %408 = vst.msk [vmem:[%s657_s3 + $0x8] sm:$0xff] %vm182_vm2, %v477_v35  ;;  %v288_v36 = vpop.f32.mrb[3].mxu0 }
 0x2ec   :  { %407 = vst.msk [vmem:[%s657_s3] sm:$0xff] %vm182_vm2, %v288_v36 }
 0x2ee   :  { %v485_v37 = vpop.f32.mrb[2].mxu1  ;;  %v480_v38 = vpop.f32.mrb[4].mxu0 }
 0x2ef   :  { %412 = vst.msk [vmem:[%s657_s3 + $0x28] sm:$0xff] %vm182_vm2, %v485_v37  ;;  %v388_v39 = vpop.f32.mrb[3].mxu1  ;;  %410 = vst.msk [vmem:[%s657_s3 + $0x18] sm:$0xff] %vm182_vm2, %v480_v38  ;;  %v298_v40 = vpop.f32.mrb[5].mxu0 }
 0x2f0   :  { %411 = vst.msk [vmem:[%s657_s3 + $0x20] sm:$0xff] %vm182_vm2, %v388_v39  ;;  %409 = vst.msk [vmem:[%s657_s3 + $0x10] sm:$0xff] %vm182_vm2, %v298_v40 }
 0x2f2   :  { %v488_v41 = vpop.f32.mrb[4].mxu1 }
 0x2f3   :  { %414 = vst.msk [vmem:[%s657_s3 + $0x38] sm:$0xff] %vm182_vm2, %v488_v41  ;;  %v398_v42 = vpop.f32.mrb[5].mxu1 }
 0x2f4   :  { %413 = vst.msk [vmem:[%s657_s3 + $0x30] sm:$0xff] %vm182_vm2, %v398_v42 }
 0x2f5   :  { %524 = dma.done.wait [#allocation3], 256  }
 0x2f6   :  { %525 = vsyncadd [#allocation3], 4294967040 }
 0x2f7   :  { %434 = vsyncpa [#allocation3], 1 }

</bundles_post_ra>
